<compile_context>
chip_gen: v7x
topology: tpu7x:2x2x1
jax: 0.10.0
libtpu: 0.0.40
codegen_flags: <defaults>
</compile_context>

<pallas_src>
import functools

import jax
import jax.numpy as jnp
import numpy as np
from jax.experimental import pallas as pl
from jax.experimental.pallas import tpu as pltpu

LANE = 128
SUBLANE = 8


def _round_up(n, m):
    return ((n + m - 1) // m) * m


def _cdiv(a, b):
    return -(-a // b)


def _pad2(a, rows, cols):
    return jnp.pad(a, ((0, rows - a.shape[0]), (0, cols - a.shape[1])))


def _tpu_caps():
    """(physical_vmem_bytes, mxu_native_width, tensorcores_per_chip), safe fallbacks."""
    vmem_bytes = 128 << 20
    mxu_native = 256
    n_tc = 1
    try:
        kind = jax.devices()[0].device_kind.lower()
    except Exception:
        kind = ""
    if any(v in kind for v in ("v2", "v3", "v4", "v5")):
        mxu_native = 128                      # 128-wide MXU generations
    if "7" in kind:                           # v7x: 2 TensorCores, 64 MiB VMEM per TC
        n_tc = 2
        vmem_bytes = 64 << 20
    try:
        vmem_bytes = int(getattr(pltpu.get_tpu_info(), "vmem_capacity_bytes", vmem_bytes))
    except Exception:
        pass
    return vmem_bytes, mxu_native, n_tc


def pack_params(params, *, weight_dtype=jnp.bfloat16):
    """Pad feature dims to MXU-friendly widths and cast weights to bf16, ONCE.

    Hoisted out of the per-forward path so repeated calls do not re-pad/re-cast
    the four weight matrices (wrapper HBM traffic). Zero padding is exact:
    padded K rows/cols contribute 0; padded N cols get 0 bias and stay 0.
    Returns (packed_weights_tuple, output_dim).
    """
    _, mxu_native, _ = _tpu_caps()

    def fdim(d):
        gran = mxu_native if d >= mxu_native else LANE
        return _round_up(d, gran)

    (w1, b1), (w2, b2), (w3, b3), (w4, b4) = params
    in_d, h_d = w1.shape
    h4_d = w2.shape[1]
    out_d = w4.shape[1]
    in_p, h_p, h4_p, out_p = fdim(in_d), fdim(h_d), fdim(h4_d), fdim(out_d)

    def pw(w, r, c):
        return _pad2(w, r, c).astype(weight_dtype)

    def pb(b, c):
        return _pad2(jnp.asarray(b).reshape(1, -1), 1, c).astype(jnp.float32)

    packed = (pw(w1, in_p, h_p), pb(b1, h_p),
              pw(w2, h_p, h4_p), pb(b2, h4_p),
              pw(w3, h4_p, h_p), pb(b3, h_p),
              pw(w4, h_p, out_p), pb(b4, out_p))
    return packed, out_d


def mlp_kernel(x_ref,
               w1_ref, b1_ref,
               w2_ref, b2_ref,
               w3_ref, b3_ref,
               w4_ref, b4_ref,
               o_ref,
               h1_ref, acc_ref):
    """Grid = (batch_tiles, k_tiles_over_4h). j is a reduction ('arbitrary') axis."""
    j = pl.program_id(1)

    # First K-step of this batch tile: compute fc1+relu once, zero the fc3 accumulator.
    @pl.when(j == 0)
    def _():
        h1 = jnp.dot(x_ref[...], w1_ref[...], preferred_element_type=jnp.float32)
        h1_ref[...] = jnp.maximum(h1 + b1_ref[...], 0.0).astype(h1_ref.dtype)
        acc_ref[...] = jnp.zeros_like(acc_ref)

    # fc2 (N-slice j) + relu, then accumulate its fc3 (K-slice j) contribution.
    h2 = jnp.dot(h1_ref[...], w2_ref[...], preferred_element_type=jnp.float32)
    h2 = jnp.maximum(h2 + b2_ref[...], 0.0).astype(w3_ref.dtype)
    acc_ref[...] += jnp.dot(h2, w3_ref[...], preferred_element_type=jnp.float32)

    # Last K-step: fc3 bias + relu, fc4, store.
    @pl.when(j == pl.num_programs(1) - 1)
    def _():
        h3 = jnp.maximum(acc_ref[...] + b3_ref[...], 0.0).astype(w4_ref.dtype)
        out = jnp.dot(h3, w4_ref[...], preferred_element_type=jnp.float32) + b4_ref[...]
        o_ref[...] = out.astype(o_ref.dtype)


def regression_mlp(x, packed, *, out_dim, out_dtype=jnp.float32):
    """Fused MLP forward on pre-packed weights. Returns [B, out_dim] in out_dtype.

    jit-friendly: jax.jit(functools.partial(regression_mlp, out_dim=...)).
    Use out_dtype=jnp.bfloat16 to halve output store traffic if the consumer allows.
    """
    w1p, b1p, w2p, b2p, w3p, b3p, w4p, b4p = packed
    B = x.shape[0]
    in_p, h_p = w1p.shape
    h4_p = w2p.shape[1]
    out_p = w4p.shape[1]
    assert x.shape[1] <= in_p, (x.shape, in_p)

    vmem_phys, _, n_tc = _tpu_caps()
    # Generation-aware scoped-VMEM budget: ~7/8 of physical, never above 100 MiB
    # (=> ~56 MiB on v7x, 100 MiB on v5e/v6e).
    vmem_cap = min(vmem_phys * 7 // 8, 100 << 20)
    wdt_bytes = np.dtype(w1p.dtype).itemsize
    out_bytes = np.dtype(out_dtype).itemsize

    # ---- K-tile over the 4h dimension so VMEM-resident weights fit the budget.
    res_bytes = wdt_bytes * (in_p * h_p + h_p * out_p) + 4 * (2 * h_p + out_p)

    def weight_bytes(t4_):
        nbuf = 1 if t4_ == h4_p else 2        # varying blocks get double-buffered
        return res_bytes + nbuf * (2 * wdt_bytes * h_p * t4_ + 4 * t4_)

    weight_budget = (2 * vmem_cap) // 3
    t4 = LANE
    for cand in range(h4_p, LANE - 1, -LANE):
        if h4_p % cand == 0 and weight_bytes(cand) <= weight_budget:
            t4 = cand
            break
    grid_k = h4_p // t4
    w_bytes = weight_bytes(t4)

    # ---- Batch tile sizing. Per-row VMEM cost: double-buffered x/out tiles,
    # bf16 h1 scratch, f32 accumulator scratch, f32 fc2 intermediate.
    per_row = (2 * in_p * wdt_bytes
               + 2 * out_p * out_bytes
               + h_p * wdt_bytes
               + h_p * 4
               + t4 * 4)
    tile_b_vmem = max(
        SUBLANE,
        ((vmem_cap - w_bytes - (4 << 20)) // max(per_row, 1)) // SUBLANE * SUBLANE)

    # Single-TC chips: one big tile (grid is a serial loop; splitting small
    # batches only adds per-step overhead). v7x: aim for >=4 steps so both
    # TensorCores get work and the x/out double-buffering stays active.
    gen_cap = 512 if n_tc >= 2 else 1024
    desired_steps = 2 * n_tc if n_tc >= 2 else 1
    split_tile = _round_up(max(_cdiv(B, desired_steps), SUBLANE), SUBLANE)
    tile_b = max(SUBLANE, min(gen_cap, tile_b_vmem, split_tile, _round_up(B, SUBLANE)))

    # Pad batch to a multiple of tile_b -> every grid step is a full block.
    B_pad = _round_up(B, tile_b)
    grid_b = B_pad // tile_b

    xp = _pad2(x, B_pad, in_p).astype(w1p.dtype)

    vmem_limit = int(min(max(w_bytes * 3 // 2 + tile_b * per_row * 3 // 2 + (4 << 20),
                             32 << 20), vmem_cap))

    # Grid-resident (constant index_map) arrays: single-buffer to save VMEM.
    def resident(shape):
        return pl.BlockSpec(shape, lambda i, j: (0, 0), pipeline_mode=pl.Buffered(1))

    # fc2/fc3 blocks vary with j only when the 4h axis is actually tiled.
    def kspec(shape, index_map):
        if grid_k == 1:
            return pl.BlockSpec(shape, index_map, pipeline_mode=pl.Buffered(1))
        return pl.BlockSpec(shape, index_map)

    if n_tc >= 2 and grid_b >= 2:
        batch_sem = getattr(pltpu, "CORE_PARALLEL", pltpu.PARALLEL)
    else:
        batch_sem = pltpu.PARALLEL

    grid_spec = pltpu.PrefetchScalarGridSpec(
        num_scalar_prefetch=0,
        grid=(grid_b, grid_k),
        in_specs=[
            pl.BlockSpec((tile_b, in_p), lambda i, j: (i, 0)),
            resident((in_p, h_p)), resident((1, h_p)),
            kspec((h_p, t4), lambda i, j: (0, j)),
            kspec((1, t4), lambda i, j: (0, j)),
            kspec((t4, h_p), lambda i, j: (j, 0)),
            resident((1, h_p)),
            resident((h_p, out_p)), resident((1, out_p)),
        ],
        out_specs=pl.BlockSpec((tile_b, out_p), lambda i, j: (i, 0)),
        scratch_shapes=[
            pltpu.VMEM((tile_b, h_p), w1p.dtype),    # relu(fc1) kept in bf16
            pltpu.VMEM((tile_b, h_p), jnp.float32),  # fc3 accumulator
        ],
    )

    out_padded = pl.pallas_call(
        mlp_kernel,
        out_shape=jax.ShapeDtypeStruct((B_pad, out_p), out_dtype),
        grid_spec=grid_spec,
        compiler_params=pltpu.CompilerParams(
            dimension_semantics=(batch_sem, pltpu.ARBITRARY),
            vmem_limit_bytes=vmem_limit,
        ),
    )(xp, w1p, b1p, w2p, b2p, w3p, b3p, w4p, b4p)

    # TODO(synk): latency-critical consumers could read the padded [B_pad, out_p]
    # buffer directly (fusing this slice away) instead of materializing the copy.
    return out_padded[:B, :out_dim]


def init_params(key, input_dim, hidden_dim, output_dim, dtype=jnp.float32):
    """Deterministic init mimicking nn.Linear's U(-1/sqrt(fan_in), 1/sqrt(fan_in))."""
    dims = [(input_dim, hidden_dim),
            (hidden_dim, hidden_dim * 4),
            (hidden_dim * 4, hidden_dim),
            (hidden_dim, output_dim)]
    params = []
    for fan_in, fan_out in dims:
        key, kw, kb = jax.random.split(key, 3)
        bound = float(fan_in) ** -0.5
        w = jax.random.uniform(kw, (fan_in, fan_out), dtype, -bound, bound)
        b = jax.random.uniform(kb, (fan_out,), dtype, -bound, bound)
        params.append((w, b))
    return params


def reference_forward(x, params):
    h = x
    for i, (w, b) in enumerate(params):
        h = h @ w + b
        if i < len(params) - 1:
            h = jnp.maximum(h, 0.0)
    return h


if __name__ == "__main__":
    key = jax.random.PRNGKey(0)
    batch, input_dim, hidden_dim, output_dim = 8, 16, 32, 4

    key, kx = jax.random.split(key)
    x = jax.random.normal(kx, (batch, input_dim), jnp.float32)
    params = init_params(key, input_dim, hidden_dim, output_dim)

    # Pack (pad + bf16-cast) the weights ONCE, outside the per-call path.
    packed, out_dim = pack_params(params)

    fwd = jax.jit(functools.partial(regression_mlp, out_dim=out_dim))
    out = jax.block_until_ready(fwd(x, packed))

    # f32 reference; kernel uses bf16 operands with f32 accumulation, so use a
    # correspondingly looser tolerance.
    ref = reference_forward(x, params)
    assert out.shape == (batch, output_dim), out.shape
    assert jnp.allclose(out, ref, atol=2e-2, rtol=2e-2), "mismatch vs reference"

    print("KERNEL_OK")
</pallas_src>

<mosaic_0001>
module attributes {stable_mosaic.version = 11 : i64} {
  func.func @mlp_kernel(%arg0: i32, %arg1: i32, %arg2: memref<8x128xbf16, #tpu.memory_space<vmem>>, %arg3: memref<128x128xbf16, #tpu.memory_space<vmem>>, %arg4: memref<1x128xf32, #tpu.memory_space<vmem>>, %arg5: memref<128x128xbf16, #tpu.memory_space<vmem>>, %arg6: memref<1x128xf32, #tpu.memory_space<vmem>>, %arg7: memref<128x128xbf16, #tpu.memory_space<vmem>>, %arg8: memref<1x128xf32, #tpu.memory_space<vmem>>, %arg9: memref<128x128xbf16, #tpu.memory_space<vmem>>, %arg10: memref<1x128xf32, #tpu.memory_space<vmem>>, %arg11: memref<8x128xf32, #tpu.memory_space<vmem>>, %arg12: memref<8x128xbf16, #tpu.memory_space<vmem>>, %arg13: memref<8x128xf32, #tpu.memory_space<vmem>>) attributes {dimension_semantics = [#tpu.dimension_semantics<parallel>, #tpu.dimension_semantics<arbitrary>], iteration_bounds = array<i64: 1, 1>, scalar_prefetch = 0 : i64, scratch_operands = 2 : i64, tpu.core_type = #tpu.core_type<tc>, window_params = [{transform_indices = @transform_0, window_bounds = array<i64: 8, 128>}, {pipeline_mode = #tpu.pipeline_mode<synchronous>, transform_indices = @transform_1, window_bounds = array<i64: 128, 128>}, {pipeline_mode = #tpu.pipeline_mode<synchronous>, transform_indices = @transform_2, window_bounds = array<i64: 1, 128>}, {pipeline_mode = #tpu.pipeline_mode<synchronous>, transform_indices = @transform_3, window_bounds = array<i64: 128, 128>}, {pipeline_mode = #tpu.pipeline_mode<synchronous>, transform_indices = @transform_4, window_bounds = array<i64: 1, 128>}, {pipeline_mode = #tpu.pipeline_mode<synchronous>, transform_indices = @transform_5, window_bounds = array<i64: 128, 128>}, {pipeline_mode = #tpu.pipeline_mode<synchronous>, transform_indices = @transform_6, window_bounds = array<i64: 1, 128>}, {pipeline_mode = #tpu.pipeline_mode<synchronous>, transform_indices = @transform_7, window_bounds = array<i64: 128, 128>}, {pipeline_mode = #tpu.pipeline_mode<synchronous>, transform_indices = @transform_8, window_bounds = array<i64: 1, 128>}, {transform_indices = @transform_9, window_bounds = array<i64: 8, 128>}]} {
    %c0_i32 = arith.constant 0 : i32
    %0 = arith.cmpi eq, %arg1, %c0_i32 : i32
    %1 = arith.extui %0 : i1 to i32
    %c0_i32_0 = arith.constant 0 : i32
    %2 = arith.cmpi ne, %1, %c0_i32_0 : i32
    scf.if %2 {
      %c0_16 = arith.constant 0 : index
      %c0_17 = arith.constant 0 : index
      %20 = vector.load %arg2[%c0_16, %c0_17] : memref<8x128xbf16, #tpu.memory_space<vmem>>, vector<8x128xbf16>
      %c0_18 = arith.constant 0 : index
      %c0_19 = arith.constant 0 : index
      %21 = vector.load %arg3[%c0_18, %c0_19] : memref<128x128xbf16, #tpu.memory_space<vmem>>, vector<128x128xbf16>
      %cst_20 = arith.constant dense<0.000000e+00> : vector<8x128xf32>
      %22 = tpu.matmul %20, %21, %cst_20 {dimension_numbers = #tpu.dot_dimension_numbers<[1], [0], [0], [1], [0, 0, 1, 1], [], []>} : vector<8x128xbf16>, vector<128x128xbf16>, vector<8x128xf32> -> vector<8x128xf32>
      %c0_21 = arith.constant 0 : index
      %c0_22 = arith.constant 0 : index
      %23 = vector.load %arg4[%c0_21, %c0_22] : memref<1x128xf32, #tpu.memory_space<vmem>>, vector<1x128xf32>
      %24 = vector.broadcast %23 : vector<1x128xf32> to vector<8x128xf32>
      %25 = arith.addf %22, %24 : vector<8x128xf32>
      %cst_23 = arith.constant 0.000000e+00 : f32
      %26 = vector.broadcast %cst_23 : f32 to vector<8x128xf32>
      %27 = arith.maximumf %25, %26 : vector<8x128xf32>
      %28 = arith.truncf %27 : vector<8x128xf32> to vector<8x128xbf16>
      %c0_24 = arith.constant 0 : index
      %c0_25 = arith.constant 0 : index
      %29 = vector.load %arg12[%c0_24, %c0_25] : memref<8x128xbf16, #tpu.memory_space<vmem>>, vector<8x128xbf16>
      tpu.vector_store %arg12[%c0_24, %c0_25], %28 {strides = array<i32>} : memref<8x128xbf16, #tpu.memory_space<vmem>>, vector<8x128xbf16>,
      %cst_26 = arith.constant 0.000000e+00 : f32
      %30 = vector.broadcast %cst_26 : f32 to vector<8x128xf32>
      %c0_27 = arith.constant 0 : index
      %c0_28 = arith.constant 0 : index
      %31 = vector.load %arg13[%c0_27, %c0_28] : memref<8x128xf32, #tpu.memory_space<vmem>>, vector<8x128xf32>
      tpu.vector_store %arg13[%c0_27, %c0_28], %30 {strides = array<i32>} : memref<8x128xf32, #tpu.memory_space<vmem>>, vector<8x128xf32>,
    } else {
    }
    %c0 = arith.constant 0 : index
    %c0_1 = arith.constant 0 : index
    %3 = vector.load %arg12[%c0, %c0_1] : memref<8x128xbf16, #tpu.memory_space<vmem>>, vector<8x128xbf16>
    %c0_2 = arith.constant 0 : index
    %c0_3 = arith.constant 0 : index
    %4 = vector.load %arg5[%c0_2, %c0_3] : memref<128x128xbf16, #tpu.memory_space<vmem>>, vector<128x128xbf16>
    %cst = arith.constant dense<0.000000e+00> : vector<8x128xf32>
    %5 = tpu.matmul %3, %4, %cst {dimension_numbers = #tpu.dot_dimension_numbers<[1], [0], [0], [1], [0, 0, 1, 1], [], []>} : vector<8x128xbf16>, vector<128x128xbf16>, vector<8x128xf32> -> vector<8x128xf32>
    %c0_4 = arith.constant 0 : index
    %c0_5 = arith.constant 0 : index
    %6 = vector.load %arg6[%c0_4, %c0_5] : memref<1x128xf32, #tpu.memory_space<vmem>>, vector<1x128xf32>
    %7 = vector.broadcast %6 : vector<1x128xf32> to vector<8x128xf32>
    %8 = arith.addf %5, %7 : vector<8x128xf32>
    %cst_6 = arith.constant 0.000000e+00 : f32
    %9 = vector.broadcast %cst_6 : f32 to vector<8x128xf32>
    %10 = arith.maximumf %8, %9 : vector<8x128xf32>
    %11 = arith.truncf %10 : vector<8x128xf32> to vector<8x128xbf16>
    %c0_7 = arith.constant 0 : index
    %c0_8 = arith.constant 0 : index
    %12 = vector.load %arg13[%c0_7, %c0_8] : memref<8x128xf32, #tpu.memory_space<vmem>>, vector<8x128xf32>
    %c0_9 = arith.constant 0 : index
    %c0_10 = arith.constant 0 : index
    %13 = vector.load %arg7[%c0_9, %c0_10] : memref<128x128xbf16, #tpu.memory_space<vmem>>, vector<128x128xbf16>
    %cst_11 = arith.constant dense<0.000000e+00> : vector<8x128xf32>
    %14 = tpu.matmul %11, %13, %cst_11 {dimension_numbers = #tpu.dot_dimension_numbers<[1], [0], [0], [1], [0, 0, 1, 1], [], []>} : vector<8x128xbf16>, vector<128x128xbf16>, vector<8x128xf32> -> vector<8x128xf32>
    %15 = arith.addf %12, %14 : vector<8x128xf32>
    %c0_12 = arith.constant 0 : index
    %c0_13 = arith.constant 0 : index
    %16 = vector.load %arg13[%c0_12, %c0_13] : memref<8x128xf32, #tpu.memory_space<vmem>>, vector<8x128xf32>
    tpu.vector_store %arg13[%c0_12, %c0_13], %15 {strides = array<i32>} : memref<8x128xf32, #tpu.memory_space<vmem>>, vector<8x128xf32>,
    %c0_i32_14 = arith.constant 0 : i32
    %17 = arith.cmpi eq, %arg1, %c0_i32_14 : i32
    %18 = arith.extui %17 : i1 to i32
    %c0_i32_15 = arith.constant 0 : i32
    %19 = arith.cmpi ne, %18, %c0_i32_15 : i32
    scf.if %19 {
      %c0_16 = arith.constant 0 : index
      %c0_17 = arith.constant 0 : index
      %20 = vector.load %arg13[%c0_16, %c0_17] : memref<8x128xf32, #tpu.memory_space<vmem>>, vector<8x128xf32>
      %c0_18 = arith.constant 0 : index
      %c0_19 = arith.constant 0 : index
      %21 = vector.load %arg8[%c0_18, %c0_19] : memref<1x128xf32, #tpu.memory_space<vmem>>, vector<1x128xf32>
      %22 = vector.broadcast %21 : vector<1x128xf32> to vector<8x128xf32>
      %23 = arith.addf %20, %22 : vector<8x128xf32>
      %cst_20 = arith.constant 0.000000e+00 : f32
      %24 = vector.broadcast %cst_20 : f32 to vector<8x128xf32>
      %25 = arith.maximumf %23, %24 : vector<8x128xf32>
      %26 = arith.truncf %25 : vector<8x128xf32> to vector<8x128xbf16>
      %c0_21 = arith.constant 0 : index
      %c0_22 = arith.constant 0 : index
      %27 = vector.load %arg9[%c0_21, %c0_22] : memref<128x128xbf16, #tpu.memory_space<vmem>>, vector<128x128xbf16>
      %cst_23 = arith.constant dense<0.000000e+00> : vector<8x128xf32>
      %28 = tpu.matmul %26, %27, %cst_23 {dimension_numbers = #tpu.dot_dimension_numbers<[1], [0], [0], [1], [0, 0, 1, 1], [], []>} : vector<8x128xbf16>, vector<128x128xbf16>, vector<8x128xf32> -> vector<8x128xf32>
      %c0_24 = arith.constant 0 : index
      %c0_25 = arith.constant 0 : index
      %29 = vector.load %arg10[%c0_24, %c0_25] : memref<1x128xf32, #tpu.memory_space<vmem>>, vector<1x128xf32>
      %30 = vector.broadcast %29 : vector<1x128xf32> to vector<8x128xf32>
      %31 = arith.addf %28, %30 : vector<8x128xf32>
      %c0_26 = arith.constant 0 : index
      %c0_27 = arith.constant 0 : index
      %32 = vector.load %arg11[%c0_26, %c0_27] : memref<8x128xf32, #tpu.memory_space<vmem>>, vector<8x128xf32>
      tpu.vector_store %arg11[%c0_26, %c0_27], %31 {strides = array<i32>} : memref<8x128xf32, #tpu.memory_space<vmem>>, vector<8x128xf32>,
    } else {
    }
    return
  }
  func.func @transform_0(%arg0: i32, %arg1: i32) -> (i32, i32) {
    %c0_i32 = arith.constant 0 : i32
    %c0_i32_0 = arith.constant 0 : i32
    return %arg0, %c0_i32 : i32, i32
  }
  func.func @transform_1(%arg0: i32, %arg1: i32) -> (i32, i32) {
    %c0_i32 = arith.constant 0 : i32
    %c0_i32_0 = arith.constant 0 : i32
    %c0_i32_1 = arith.constant 0 : i32
    return %c0_i32, %c0_i32_0 : i32, i32
  }
  func.func @transform_2(%arg0: i32, %arg1: i32) -> (i32, i32) {
    %c0_i32 = arith.constant 0 : i32
    %c0_i32_0 = arith.constant 0 : i32
    %c0_i32_1 = arith.constant 0 : i32
    return %c0_i32, %c0_i32_0 : i32, i32
  }
  func.func @transform_3(%arg0: i32, %arg1: i32) -> (i32, i32) {
    %c0_i32 = arith.constant 0 : i32
    %c0_i32_0 = arith.constant 0 : i32
    return %c0_i32, %arg1 : i32, i32
  }
  func.func @transform_4(%arg0: i32, %arg1: i32) -> (i32, i32) {
    %c0_i32 = arith.constant 0 : i32
    %c0_i32_0 = arith.constant 0 : i32
    return %c0_i32, %arg1 : i32, i32
  }
  func.func @transform_5(%arg0: i32, %arg1: i32) -> (i32, i32) {
    %c0_i32 = arith.constant 0 : i32
    %c0_i32_0 = arith.constant 0 : i32
    return %arg1, %c0_i32 : i32, i32
  }
  func.func @transform_6(%arg0: i32, %arg1: i32) -> (i32, i32) {
    %c0_i32 = arith.constant 0 : i32
    %c0_i32_0 = arith.constant 0 : i32
    %c0_i32_1 = arith.constant 0 : i32
    return %c0_i32, %c0_i32_0 : i32, i32
  }
  func.func @transform_7(%arg0: i32, %arg1: i32) -> (i32, i32) {
    %c0_i32 = arith.constant 0 : i32
    %c0_i32_0 = arith.constant 0 : i32
    %c0_i32_1 = arith.constant 0 : i32
    return %c0_i32, %c0_i32_0 : i32, i32
  }
  func.func @transform_8(%arg0: i32, %arg1: i32) -> (i32, i32) {
    %c0_i32 = arith.constant 0 : i32
    %c0_i32_0 = arith.constant 0 : i32
    %c0_i32_1 = arith.constant 0 : i32
    return %c0_i32, %c0_i32_0 : i32, i32
  }
  func.func @transform_9(%arg0: i32, %arg1: i32) -> (i32, i32) {
    %c0_i32 = arith.constant 0 : i32
    %c0_i32_0 = arith.constant 0 : i32
    return %arg0, %c0_i32 : i32, i32
  }
}

</mosaic_0001>

<bundles_post_ra>
// kernel: regression_mlp.1
= control target key start
LH: loop header
LB: loop body
LE: loop exit
PB: predicated region body
PF: predicated region fallthrough
CT: control target
= control target key end

     0   :  { %14 = vsyncpa [#allocation5], 0  ;;  %s1038_s0 = inlined_call_operand.vmem [shape: bf16[8,128], index: 0, kind: input, shape index: {}]   ;;  %s1039_s1 = inlined_call_operand.hbm [shape: bf16[128,128], index: 1, kind: input, shape index: {}]   ;;  %s1040_s2 = inlined_call_operand.vmem [shape: f32[1,128], index: 2, kind: input, shape index: {}]   ;;  %s1041_s3 = inlined_call_operand.hbm [shape: bf16[128,128], index: 3, kind: input, shape index: {}]   ;;  %s1042_s4 = inlined_call_operand.vmem [shape: f32[1,128], index: 4, kind: input, shape index: {}]   ;;  %s1043_s5 = inlined_call_operand.hbm [shape: bf16[128,128], index: 5, kind: input, shape index: {}]   ;;  %s1044_s6 = inlined_call_operand.vmem [shape: f32[1,128], index: 6, kind: input, shape index: {}]   ;;  %s1045_s7 = inlined_call_operand.hbm [shape: bf16[128,128], index: 7, kind: input, shape index: {}]   ;;  %s1046_s8 = inlined_call_operand.vmem [shape: f32[1,128], index: 8, kind: input, shape index: {}]   ;;  %s1047_s9 = inlined_call_operand.vmem [shape: f32[8,128], index: 9, kind: output, shape index: {}]  }
   0x1   :  { %15 = vsyncpa [#allocation7], 0 }
   0x2   :  { %16 = vsyncpa [#allocation10], 0  ;;  %s848_s30 = smov [#allocation6]   ;;  %s849_s11 = smov [#allocation4]  }
   0x3   :  { %s38_s10 = sshll.u32 %s848_s30, 4  ;;  %s24_s12 = sshll.u32 %s849_s11, 4  ;;  %s39_s10 = int_to_ptr.vmem [resolvable:$true] %s38_s10  ;;  %s906_s12 = int_to_ptr.vmem [resolvable:$true] %s24_s12 }
   0x4   :  { %s754_s15 = scalar_lea.hbm %s1041_s3, 1024 }
   0x5   :  { %p755_p0 = scmp.ne.s32.totalorder %s1041_s3, %s754_s15  ;;  %p758_p1 = scmp.lt.u32.totalorder %s754_s15, %s1041_s3 }
   0x7   :  { %p760_p2 = pnand %p758_p1, %p755_p0 }
   0x9   :  { %763 = shalt.err (!%p760_p2)
}
   0xa   :  { %s764_s20 = scalar_lea.vmem %s39_s10, 1024  ;;  %p769_p4 = scmp.lt.s32.totalorder %s39_s10, %s39_s10 }
   0xb   :  { %p765_p3 = scmp.ne.s32.totalorder %s39_s10, %s764_s20  ;;  %p770_p5 = scmp.lt.s32.totalorder %s764_s20, %s764_s20 }
   0xd   :  { %p771_p6 = por %p770_p5, %p769_p4 }
   0xf   :  { %p772_p7 = pnand %p771_p6, %p765_p3 }
  0x11   :  { %775 = shalt.err (!%p772_p7)
}
  0x12   :  { %s850_s21 = smov 64   ;;  %s851_s22 = smov 4  }
  0x13   :  { %44 = dma.hbm_to_vmem [thread:$0]  %s1041_s3, 1024, %s39_s10, [#allocation7], %s850_s21, %s850_s21, %s851_s22  }
  0x14   :  { %s776_s27 = scalar_lea.hbm %s1039_s1, 1024 }
  0x15   :  { %p777_p8 = scmp.ne.s32.totalorder %s1039_s1, %s776_s27  ;;  %p780_p9 = scmp.lt.u32.totalorder %s776_s27, %s1039_s1 }
  0x17   :  { %p782_p10 = pnand %p780_p9, %p777_p8 }
  0x19   :  { %785 = shalt.err (!%p782_p10)
}
  0x1a   :  { %s786_s13 = scalar_lea.vmem %s906_s12, 1024  ;;  %p791_p12 = scmp.lt.s32.totalorder %s906_s12, %s906_s12 }
  0x1b   :  { %p787_p11 = scmp.ne.s32.totalorder %s906_s12, %s786_s13  ;;  %p792_p13 = scmp.lt.s32.totalorder %s786_s13, %s786_s13 }
  0x1d   :  { %p793_p0 = por %p792_p13, %p791_p12 }
  0x1f   :  { %p794_p1 = pnand %p793_p0, %p787_p11 }
  0x21   :  { %797 = shalt.err (!%p794_p1)
}
  0x22   :  { %30 = dma.hbm_to_vmem [thread:$0]  %s1039_s1, 1024, %s906_s12, [#allocation5], %s850_s21, %s850_s21, %s851_s22  }
  0x23   :  { %s852_s14 = smov [#allocation8]   ;;  %s853_s16 = smov [#allocation9]  }
  0x24   :  { %s52_s15 = sshll.u32 %s852_s14, 4  ;;  %s66_s17 = sshll.u32 %s853_s16, 4  ;;  %s53_s15 = int_to_ptr.vmem [resolvable:$true] %s52_s15  ;;  %s943_s17 = int_to_ptr.vmem [resolvable:$true] %s66_s17 }
  0x25   :  { %s798_s20 = scalar_lea.hbm %s1043_s5, 1024 }
  0x26   :  { %p799_p2 = scmp.ne.s32.totalorder %s1043_s5, %s798_s20  ;;  %p802_p3 = scmp.lt.u32.totalorder %s798_s20, %s1043_s5 }
  0x28   :  { %p804_p4 = pnand %p802_p3, %p799_p2 }
  0x2a   :  { %807 = shalt.err (!%p804_p4)
}
  0x2b   :  { %s808_s1 = scalar_lea.vmem %s53_s15, 1024  ;;  %p813_p6 = scmp.lt.s32.totalorder %s53_s15, %s53_s15 }
  0x2c   :  { %p809_p5 = scmp.ne.s32.totalorder %s53_s15, %s808_s1  ;;  %p814_p7 = scmp.lt.s32.totalorder %s808_s1, %s808_s1 }
  0x2e   :  { %p815_p8 = por %p814_p7, %p813_p6 }
  0x30   :  { %p816_p9 = pnand %p815_p8, %p809_p5 }
  0x32   :  { %819 = shalt.err (!%p816_p9)
}
  0x33   :  { %58 = dma.hbm_to_vmem [thread:$0]  %s1043_s5, 1024, %s53_s15, [#allocation7], %s850_s21, %s850_s21, %s851_s22  }
  0x34   :  { %s820_s30 = scalar_lea.hbm %s1045_s7, 1024 }
  0x35   :  { %p821_p10 = scmp.ne.s32.totalorder %s1045_s7, %s820_s30  ;;  %p824_p11 = scmp.lt.u32.totalorder %s820_s30, %s1045_s7 }
  0x37   :  { %p826_p12 = pnand %p824_p11, %p821_p10 }
  0x39   :  { %829 = shalt.err (!%p826_p12)
}
  0x3a   :  { %s830_s14 = scalar_lea.vmem %s943_s17, 1024  ;;  %p835_p0 = scmp.lt.s32.totalorder %s943_s17, %s943_s17 }
  0x3b   :  { %p831_p13 = scmp.ne.s32.totalorder %s943_s17, %s830_s14  ;;  %p836_p1 = scmp.lt.s32.totalorder %s830_s14, %s830_s14 }
  0x3d   :  { %p837_p2 = por %p836_p1, %p835_p0 }
  0x3f   :  { %p838_p3 = pnand %p837_p2, %p831_p13 }
  0x41   :  { %841 = shalt.err (!%p838_p3)
}
  0x42   :  { %72 = dma.hbm_to_vmem [thread:$0]  %s1045_s7, 1024, %s943_s17, [#allocation10], %s850_s21, %s850_s21, %s851_s22  }
  0x43   :  { %842 = dma.done.wait [#allocation5], 1024  }
  0x44   :  { %843 = vsyncadd [#allocation5], 4294966272 }
  0x45   :  { %844 = dma.done.wait [#allocation7], 2048  }
  0x46   :  { %845 = vsyncadd [#allocation7], 4294965248 }
  0x47   :  { %846 = dma.done.wait [#allocation10], 1024  }
  0x48   :  { %847 = vsyncadd [#allocation10], 4294966272  ;;  %v854_v0 = vmov 0.0   ;;  %vm855_vm0 = vmmov 0   ;;  %v722_v1 = vld [vmem:[#allocation4] sm:$0xff]   ;;  %v723_v2 = vld [vmem:[#allocation4 + $0x8] sm:$0xff]  }
  0x49   :  { %634 = vmatprep.subr.bf16.mxu0 %v854_v0  ;;  %650 = vmatprep.mubr.msk.bf16.mxu0 %vm855_vm0, %v854_v0  ;;  %v724_v3 = vld [vmem:[#allocation4 + $0x10] sm:$0xff]   ;;  %v730_v4 = vld [vmem:[#allocation6] sm:$0xff]   ;;  %v725_v5 = vld [vmem:[#allocation4 + $0x18] sm:$0xff]  }
  0x4a   :  { %654 = vmatprep.subr.bf16.mxu1 %v854_v0  ;;  %670 = vmatprep.mubr.msk.bf16.mxu1 %vm855_vm0, %v854_v0  ;;  %v731_v6 = vld [vmem:[#allocation6 + $0x8] sm:$0xff]   ;;  %v726_v7 = vld [vmem:[#allocation4 + $0x20] sm:$0xff]   ;;  %v732_v8 = vld [vmem:[#allocation6 + $0x10] sm:$0xff]  }
  0x4b   :  { %635 = vmatpush3.bf16.msra.mxu0 %v722_v1  ;;  %655 = vmatpush3.bf16.msra.mxu1 %v730_v4  ;;  %v727_v9 = vld [vmem:[#allocation4 + $0x28] sm:$0xff]   ;;  %v733_v10 = vld [vmem:[#allocation6 + $0x18] sm:$0xff]   ;;  %v728_v11 = vld [vmem:[#allocation4 + $0x30] sm:$0xff]  }
  0x4c   :  { %636 = vmatprep.subr.bf16.mxu0 %v854_v0  ;;  %656 = vmatprep.subr.bf16.mxu1 %v854_v0  ;;  %v729_v12 = vld [vmem:[#allocation4 + $0x38] sm:$0xff]   ;;  %v734_v14 = vld [vmem:[#allocation6 + $0x20] sm:$0xff]   ;;  %v735_v15 = vld [vmem:[#allocation6 + $0x28] sm:$0xff]  }
  0x4d   :  { %v92_v13 = vld [vmem:[%s1038_s0] sm:$0xf]  ;;  %v736_v16 = vld [vmem:[#allocation6 + $0x30] sm:$0xff]   ;;  %v738_v18 = vld [vmem:[#allocation8] sm:$0xff]  }
  0x4e   :  { %v737_v17 = vld [vmem:[#allocation6 + $0x38] sm:$0xff]   ;;  %v739_v19 = vld [vmem:[#allocation8 + $0x8] sm:$0xff]   ;;  %v740_v20 = vld [vmem:[#allocation8 + $0x10] sm:$0xff]  }
  0x4f   :  { %637 = vmatpush3.bf16.msra.mxu0 %v723_v2  ;;  %657 = vmatpush3.bf16.msra.mxu1 %v731_v6  ;;  %v741_v21 = vld [vmem:[#allocation8 + $0x18] sm:$0xff]   ;;  %v742_v22 = vld [vmem:[#allocation8 + $0x20] sm:$0xff]   ;;  %v743_v23 = vld [vmem:[#allocation8 + $0x28] sm:$0xff]  }
  0x50   :  { %638 = vmatprep.subr.bf16.mxu0 %v854_v0  ;;  %658 = vmatprep.subr.bf16.mxu1 %v854_v0  ;;  %v562_v24 = vld [vmem:[%s1040_s2] ss:$0 sm:$0xff]  ;;  %v744_v33 = vld [vmem:[#allocation8 + $0x30] sm:$0xff]   ;;  %v746_v35 = vld [vmem:[#allocation9] sm:$0xff]  }
  0x51   :  { %v745_v34 = vld [vmem:[#allocation8 + $0x38] sm:$0xff]   ;;  %v747_v36 = vld [vmem:[#allocation9 + $0x8] sm:$0xff]   ;;  %v748_v37 = vld [vmem:[#allocation9 + $0x10] sm:$0xff]  }
  0x52   :  { %v749_v38 = vld [vmem:[#allocation9 + $0x18] sm:$0xff]   ;;  %v750_v39 = vld [vmem:[#allocation9 + $0x20] sm:$0xff]   ;;  %v751_v40 = vld [vmem:[#allocation9 + $0x28] sm:$0xff]  }
  0x53   :  { %639 = vmatpush3.bf16.msra.mxu0 %v724_v3  ;;  %659 = vmatpush3.bf16.msra.mxu1 %v732_v8  ;;  %v571_v41 = vld [vmem:[%s1042_s4] ss:$0 sm:$0xff]  ;;  %v752_v49 = vld [vmem:[#allocation9 + $0x30] sm:$0xff]  }
  0x54   :  { %640 = vmatprep.subr.bf16.mxu0 %v854_v0  ;;  %660 = vmatprep.subr.bf16.mxu1 %v854_v0  ;;  %v753_v50 = vld [vmem:[#allocation9 + $0x38] sm:$0xff]  }
  0x55   :  { %v588_v51 = vld [vmem:[%s1044_s6] ss:$0 sm:$0xff] }
  0x56   :  { %v589_v59 = vld [vmem:[%s1046_s8] ss:$0 sm:$0xff] }
  0x57   :  { %641 = vmatpush3.bf16.msra.mxu0 %v725_v5  ;;  %661 = vmatpush3.bf16.msra.mxu1 %v733_v10 }
  0x58   :  { %642 = vmatprep.subr.bf16.mxu0 %v854_v0  ;;  %662 = vmatprep.subr.bf16.mxu1 %v854_v0 }
  0x5b   :  { %643 = vmatpush3.bf16.msra.mxu0 %v726_v7  ;;  %663 = vmatpush3.bf16.msra.mxu1 %v734_v14 }
  0x5c   :  { %644 = vmatprep.subr.bf16.mxu0 %v854_v0  ;;  %664 = vmatprep.subr.bf16.mxu1 %v854_v0 }
  0x5f   :  { %645 = vmatpush3.bf16.msra.mxu0 %v727_v9  ;;  %665 = vmatpush3.bf16.msra.mxu1 %v735_v15 }
  0x60   :  { %646 = vmatprep.subr.bf16.mxu0 %v854_v0  ;;  %666 = vmatprep.subr.bf16.mxu1 %v854_v0 }
  0x63   :  { %647 = vmatpush3.bf16.msra.mxu0 %v728_v11  ;;  %667 = vmatpush3.bf16.msra.mxu1 %v736_v16 }
  0x64   :  { %648 = vmatprep.subr.bf16.mxu0 %v854_v0  ;;  %668 = vmatprep.subr.bf16.mxu1 %v854_v0 }
  0x67   :  { %649 = vmatpush3.bf16.msra.mxu0 %v729_v12  ;;  %669 = vmatpush3.bf16.msra.mxu1 %v737_v17 }
  0x68   :  { %674 = vmatprep.subr.bf16.mxu0 %v854_v0  ;;  %694 = vmatprep.subr.bf16.mxu1 %v854_v0 }
  0x6a   :  { %651 = vmatmul.mubr.bf16.vlgmr.msra.gmra.mrb[0].mxu0 %v92_v13 }
  0x6b   :  { %690 = vmatprep.mubr.msk.bf16.mxu0 %vm855_vm0, %v854_v0  ;;  %675 = vmatpush3.bf16.msra.mxu0 %v738_v18 }
  0x6c   :  { %676 = vmatprep.subr.bf16.mxu0 %v854_v0 }
  0x6f   :  { %677 = vmatpush3.bf16.msra.mxu0 %v739_v19 }
  0x70   :  { %678 = vmatprep.subr.bf16.mxu0 %v854_v0 }
  0x73   :  { %679 = vmatpush3.bf16.msra.mxu0 %v740_v20 }
  0x74   :  { %680 = vmatprep.subr.bf16.mxu0 %v854_v0 }
  0x77   :  { %681 = vmatpush3.bf16.msra.mxu0 %v741_v21 }
  0x78   :  { %682 = vmatprep.subr.bf16.mxu0 %v854_v0 }
  0x7b   :  { %683 = vmatpush3.bf16.msra.mxu0 %v742_v22 }
  0x7c   :  { %684 = vmatprep.subr.bf16.mxu0 %v854_v0 }
  0x7f   :  { %685 = vmatpush3.bf16.msra.mxu0 %v743_v23 }
  0x80   :  { %686 = vmatprep.subr.bf16.mxu0 %v854_v0 }
  0x83   :  { %687 = vmatpush3.bf16.msra.mxu0 %v744_v33 }
  0x84   :  { %688 = vmatprep.subr.bf16.mxu0 %v854_v0 }
  0x87   :  { %689 = vmatpush3.bf16.msra.mxu0 %v745_v34 }
 0x13d   :  { %v198_v25 = vpop.f32.mrb[0].mxu0 }
 0x13e   :  { %v199_v26 = vadd.f32 %v562_v24, %v198_v25  ;;  %v652_v27 = vpop.f32.mrb[1].mxu0 }
 0x13f   :  { %v201_v28 = vpop.f32.mrb[2].mxu0 }
 0x140   :  { %v204_v29 = vmax.f32 %v199_v26, 0.0  ;;  %v653_v30 = vpop.f32.mrb[3].mxu0 }
 0x142   :  { %v205_v31 = vpack.c.bf16 %v204_v29, %v204_v29 }
 0x144   :  { %206 = vst [vmem:[#allocation2] sm:$0xf] %v205_v31 }
 0x14b   :  { %v208_v32 = vld [vmem:[#allocation2] sm:$0xf] }
 0x14c   :  { %671 = vmatmul.mubr.bf16.vlgmr.msra.gmra.mrb[0].mxu1 %v208_v32 }
 0x14d   :  { %710 = vmatprep.mubr.msk.bf16.mxu1 %vm855_vm0, %v854_v0  ;;  %695 = vmatpush3.bf16.msra.mxu1 %v746_v35 }
 0x14e   :  { %696 = vmatprep.subr.bf16.mxu1 %v854_v0 }
 0x151   :  { %697 = vmatpush3.bf16.msra.mxu1 %v747_v36 }
 0x152   :  { %698 = vmatprep.subr.bf16.mxu1 %v854_v0 }
 0x155   :  { %699 = vmatpush3.bf16.msra.mxu1 %v748_v37 }
 0x156   :  { %700 = vmatprep.subr.bf16.mxu1 %v854_v0 }
 0x159   :  { %701 = vmatpush3.bf16.msra.mxu1 %v749_v38 }
 0x15a   :  { %702 = vmatprep.subr.bf16.mxu1 %v854_v0 }
 0x15d   :  { %703 = vmatpush3.bf16.msra.mxu1 %v750_v39 }
 0x15e   :  { %704 = vmatprep.subr.bf16.mxu1 %v854_v0 }
 0x161   :  { %705 = vmatpush3.bf16.msra.mxu1 %v751_v40 }
 0x162   :  { %706 = vmatprep.subr.bf16.mxu1 %v854_v0 }
 0x165   :  { %707 = vmatpush3.bf16.msra.mxu1 %v752_v49 }
 0x166   :  { %708 = vmatprep.subr.bf16.mxu1 %v854_v0 }
 0x169   :  { %709 = vmatpush3.bf16.msra.mxu1 %v753_v50 }
 0x21f   :  { %v314_v42 = vpop.f32.mrb[0].mxu1 }
 0x220   :  { %v315_v43 = vadd.f32 %v571_v41, %v314_v42  ;;  %v672_v44 = vpop.f32.mrb[1].mxu1 }
 0x221   :  { %v317_v45 = vpop.f32.mrb[2].mxu1 }
 0x222   :  { %v320_v46 = vmax.f32 %v315_v43, 0.0  ;;  %v673_v47 = vpop.f32.mrb[3].mxu1 }
 0x224   :  { %v321_v48 = vpack.c.bf16 %v320_v46, %v320_v46 }
 0x226   :  { %691 = vmatmul.mubr.bf16.vlgmr.msra.gmra.mrb[4].mxu0 %v321_v48 }
 0x2f9   :  { %v421_v52 = vpop.f32.mrb[4].mxu0 }
 0x2fa   :  { %v440_v53 = vadd.f32 %v588_v51, %v421_v52  ;;  %v692_v54 = vpop.f32.mrb[5].mxu0 }
 0x2fb   :  { %v424_v55 = vpop.f32.mrb[6].mxu0 }
 0x2fc   :  { %v441_v56 = vmax.f32 %v440_v53, 0.0  ;;  %v693_v57 = vpop.f32.mrb[7].mxu0 }
 0x2fe   :  { %v442_v58 = vpack.c.bf16 %v441_v56, %v441_v56 }
 0x300   :  { %711 = vmatmul.mubr.bf16.vlgmr.msra.gmra.mrb[4].mxu1 %v442_v58 }
 0x3d3   :  { %v548_v60 = vpop.f32.mrb[4].mxu1 }
 0x3d4   :  { %v549_v61 = vadd.f32 %v589_v59, %v548_v60  ;;  %v712_v62 = vpop.f32.mrb[5].mxu1 }
 0x3d5   :  { %v551_v63 = vpop.f32.mrb[6].mxu1 }
 0x3d6   :  { %554 = vst [vmem:[%s1047_s9] sm:$0xff] %v549_v61  ;;  %v713_v0 = vpop.f32.mrb[7].mxu1 }
 0x3d7   :  { %559 = vsyncpa [#allocation5], 1 }
 0x3d8   :  { %560 = vsyncpa [#allocation7], 1 }
 0x3d9   :  { %561 = vsyncpa [#allocation10], 1 }

</bundles_post_ra>
